<compile_context>
chip_gen: v6e
topology: v6e:2x2x1
jax: 0.10.0
libtpu: 0.0.40
codegen_flags: <defaults>
</compile_context>

<pallas_src>
import functools

import jax
import jax.numpy as jnp
from jax import lax
from jax.experimental import pallas as pl
from jax.experimental.pallas import tpu as pltpu

block_size = 32   # max sequence length (size of the tril buffer in the PyTorch module)
n_embd = 384      # C
head_size = 64    # H (ctor arg of the module)


def _head_kernel(x_ref, w_ref, o_ref, *, hs: int):
    """One grid step = one batch element.

    x_ref : (1, T, C)   f32   activations for this batch element
    w_ref : (C, 3*H)    bf16  densely packed [Wq | Wk | Wv]
    o_ref : (1, T, H)   f32   attention output
    """
    x = x_ref[0].astype(jnp.bfloat16)                                   # (T, C) bf16 (cast in-kernel)
    c = x_ref.shape[-1]
    t = x_ref.shape[-2]

    # Single fused MXU matmul for all three projections (f32 accumulation).
    qkv = jnp.dot(x, w_ref[...], preferred_element_type=jnp.float32)    # (T, 3H) f32

    q = qkv[:, 0 * hs:1 * hs]                                           # (T, H) static lane slices
    k = qkv[:, 1 * hs:2 * hs]
    v = qkv[:, 2 * hs:3 * hs]

    # The PyTorch module scales by C**-0.5 (n_embd), NOT head_size**-0.5 — kept as-is.
    # Fuse the scale into q (T x H): fewer VPU mults than scaling the (T x T) scores.
    scale = float(c) ** -0.5                                            # Python float -> literal
    qs = (q * scale).astype(jnp.bfloat16)
    ks = k.astype(jnp.bfloat16)

    # q @ k^T without materializing a transpose: contract the last axis of both operands.
    wei = lax.dot_general(qs, ks, (((1,), (1,)), ((), ())),
                          preferred_element_type=jnp.float32)           # (T, T) f32

    # Causal mask (the module's tril): keep col <= row.  Large finite negative instead of -inf
    # so exp underflows cleanly to 0.
    row = lax.broadcasted_iota(jnp.int32, (t, t), 0)
    col = lax.broadcasted_iota(jnp.int32, (t, t), 1)
    wei = jnp.where(col <= row, wei, -1e30)

    # Numerically stable softmax in f32; reciprocal goes to the EUP slot (essentially free).
    wei = wei - jnp.max(wei, axis=-1, keepdims=True)
    p = jnp.exp(wei)
    p = p * pl.reciprocal(jnp.sum(p, axis=-1, keepdims=True), approx=True)

    out = jnp.dot(p.astype(jnp.bfloat16), v.astype(jnp.bfloat16),
                  preferred_element_type=jnp.float32)                   # (T, H)
    o_ref[0] = out.astype(o_ref.dtype)


def pack_qkv_weights(wq_t, wk_t, wv_t):
    """Pack the three (C, H) projection weights into one dense (C, 3H) bf16 matrix.

    Call ONCE at init / weight-load time (not per forward call): this is fixed overhead
    that must not sit on the per-call path.
    """
    return jnp.concatenate([wq_t, wk_t, wv_t], axis=1).astype(jnp.bfloat16)


def head_forward(x, w_qkv):
    """x: (B, T, C) float32; w_qkv: (C, 3H) bf16 from pack_qkv_weights (weights pre-transposed
    to (in, out), i.e. PyTorch Linear y = x @ W.T)."""
    B, T, C = x.shape
    H = w_qkv.shape[1] // 3

    flops = B * (2 * T * C * (3 * H) + 2 * T * T * H + 2 * T * T * H)
    bytes_accessed = x.size * 4 + w_qkv.size * 2 + B * T * H * 4
    transcendentals = B * (T * T + T)   # exp + reciprocal

    return pl.pallas_call(
        functools.partial(_head_kernel, hs=H),
        out_shape=jax.ShapeDtypeStruct((B, T, H), jnp.float32),
        grid=(B,),
        in_specs=[
            pl.BlockSpec((1, T, C), lambda b: (b, 0, 0)),       # one batch element per step
            pl.BlockSpec((C, 3 * H), lambda b: (0, 0)),          # weights resident across steps
        ],
        out_specs=pl.BlockSpec((1, T, H), lambda b: (b, 0, 0)),
        cost_estimate=pl.CostEstimate(
            flops=flops, transcendentals=transcendentals, bytes_accessed=bytes_accessed),
        compiler_params=pltpu.CompilerParams(
            dimension_semantics=("parallel",)),                  # batch-parallel (2 TCs on v7x)
    )(x, w_qkv)


def head_reference(x, wk_t, wq_t, wv_t):
    """Pure-JAX f32 reference mirroring the PyTorch forward."""
    B, T, C = x.shape
    k = x @ wk_t
    q = x @ wq_t
    v = x @ wv_t
    wei = (q @ jnp.swapaxes(k, -2, -1)) * (C ** -0.5)
    tril = jnp.tril(jnp.ones((T, T), dtype=bool))
    wei = jnp.where(tril, wei, -jnp.inf)
    wei = jax.nn.softmax(wei, axis=-1)
    return wei @ v


if __name__ == "__main__":
    key = jax.random.PRNGKey(0)
    kx, kk, kq, kv = jax.random.split(key, 4)

    B, T, C, H = 2, block_size, n_embd, head_size
    x = jax.random.normal(kx, (B, T, C), dtype=jnp.float32)

    # Deterministic synthetic weights, pre-transposed to (in, out) = (C, H).
    wk_t = jax.random.normal(kk, (C, H), dtype=jnp.float32) * 0.02
    wq_t = jax.random.normal(kq, (C, H), dtype=jnp.float32) * 0.02
    wv_t = jax.random.normal(kv, (C, H), dtype=jnp.float32) * 0.02

    # One-time weight packing (init / load time), NOT part of the per-call path.
    w_qkv = jax.block_until_ready(pack_qkv_weights(wq_t, wk_t, wv_t))

    head_fn = jax.jit(head_forward)
    out = jax.block_until_ready(head_fn(x, w_qkv))
    ref = head_reference(x, wk_t, wq_t, wv_t)

    assert out.shape == (B, T, H)
    # bf16 matmul inputs (f32 accumulation) + approx reciprocal => looser tolerance than pure f32.
    assert jnp.allclose(out, ref, atol=2e-2, rtol=2e-2), "mismatch vs reference"

    # TODO(synk): output last dim is H=64 (<128 lanes), so the store is lane-masked; a fully
    # lane-dense output needs multi-head fusion, which is outside this single-head module.
    print("KERNEL_OK")
</pallas_src>

<mosaic_0001>
module attributes {stable_mosaic.version = 11 : i64} {
  func.func @_head_kernel(%arg0: i32, %arg1: memref<1x32x384xf32, #tpu.memory_space<vmem>>, %arg2: memref<384x192xbf16, #tpu.memory_space<vmem>>, %arg3: memref<1x32x64xf32, #tpu.memory_space<vmem>>) attributes {dimension_semantics = [#tpu.dimension_semantics<parallel>], iteration_bounds = array<i64: 2>, scalar_prefetch = 0 : i64, scratch_operands = 0 : i64, tpu.core_type = #tpu.core_type<tc>, window_params = [{transform_indices = @transform_0, window_bounds = array<i64: 1, 32, 384>}, {pipeline_mode = #tpu.pipeline_mode<synchronous>, transform_indices = @transform_1, window_bounds = array<i64: 384, 192>}, {transform_indices = @transform_2, window_bounds = array<i64: 1, 32, 64>}]} {
    %c0 = arith.constant 0 : index
    %c0_0 = arith.constant 0 : index
    %c0_1 = arith.constant 0 : index
    %0 = vector.load %arg1[%c0, %c0_0, %c0_1] : memref<1x32x384xf32, #tpu.memory_space<vmem>>, vector<1x32x384xf32>
    %1 = vector.shape_cast %0 : vector<1x32x384xf32> to vector<32x384xf32>
    %2 = arith.truncf %1 : vector<32x384xf32> to vector<32x384xbf16>
    %c0_2 = arith.constant 0 : index
    %c0_3 = arith.constant 0 : index
    %3 = vector.load %arg2[%c0_2, %c0_3] : memref<384x192xbf16, #tpu.memory_space<vmem>>, vector<384x192xbf16>
    %cst = arith.constant dense<0.000000e+00> : vector<32x192xf32>
    %4 = tpu.matmul %2, %3, %cst {dimension_numbers = #tpu.dot_dimension_numbers<[1], [0], [0], [1], [0, 0, 1, 1], [], []>} : vector<32x384xbf16>, vector<384x192xbf16>, vector<32x192xf32> -> vector<32x192xf32>
    %5 = vector.extract_strided_slice %4 {offsets = [0, 0], sizes = [32, 64], strides = [1, 1]} : vector<32x192xf32> to vector<32x64xf32>
    %6 = vector.extract_strided_slice %4 {offsets = [0, 64], sizes = [32, 64], strides = [1, 1]} : vector<32x192xf32> to vector<32x64xf32>
    %7 = vector.extract_strided_slice %4 {offsets = [0, 128], sizes = [32, 64], strides = [1, 1]} : vector<32x192xf32> to vector<32x64xf32>
    %cst_4 = arith.constant 0.0510310382 : f32
    %8 = vector.broadcast %cst_4 : f32 to vector<32x64xf32>
    %9 = arith.mulf %5, %8 : vector<32x64xf32>
    %10 = arith.truncf %9 : vector<32x64xf32> to vector<32x64xbf16>
    %11 = arith.truncf %6 : vector<32x64xf32> to vector<32x64xbf16>
    %cst_5 = arith.constant dense<0.000000e+00> : vector<32x32xf32>
    %12 = tpu.matmul %10, %11, %cst_5 {dimension_numbers = #tpu.dot_dimension_numbers<[1], [1], [0], [0], [0, 0, 1, 0], [], []>} : vector<32x64xbf16>, vector<32x64xbf16>, vector<32x32xf32> -> vector<32x32xf32>
    %13 = tpu.iota {dimensions = array<i32: 0>} : vector<32x32xi32>
    %14 = tpu.iota {dimensions = array<i32: 1>} : vector<32x32xi32>
    %15 = arith.cmpi sle, %14, %13 : vector<32x32xi32>
    %cst_6 = arith.constant -1.000000e+30 : f32
    %16 = vector.broadcast %cst_6 : f32 to vector<32x32xf32>
    %17 = arith.select %15, %12, %16 : vector<32x32xi1>, vector<32x32xf32>
    %cst_7 = arith.constant dense<0xFF800000> : vector<32xf32>
    %18 = vector.multi_reduction <maximumf>, %17, %cst_7 [1] : vector<32x32xf32> to vector<32xf32>
    %19 = vector.shape_cast %18 : vector<32xf32> to vector<32x1xf32>
    %20 = vector.broadcast %19 : vector<32x1xf32> to vector<32x32xf32>
    %21 = arith.subf %17, %20 : vector<32x32xf32>
    %22 = math.exp %21 : vector<32x32xf32>
    %cst_8 = arith.constant dense<0.000000e+00> : vector<32xf32>
    %23 = vector.multi_reduction <add>, %22, %cst_8 [1] : vector<32x32xf32> to vector<32xf32>
    %24 = vector.shape_cast %23 : vector<32xf32> to vector<32x1xf32>
    %25 = tpu.reciprocal %24 {approx = true} : vector<32x1xf32> -> vector<32x1xf32>
    %26 = vector.broadcast %25 : vector<32x1xf32> to vector<32x32xf32>
    %27 = arith.mulf %22, %26 : vector<32x32xf32>
    %28 = arith.truncf %27 : vector<32x32xf32> to vector<32x32xbf16>
    %29 = arith.truncf %7 : vector<32x64xf32> to vector<32x64xbf16>
    %cst_9 = arith.constant dense<0.000000e+00> : vector<32x64xf32>
    %30 = tpu.matmul %28, %29, %cst_9 {dimension_numbers = #tpu.dot_dimension_numbers<[1], [0], [0], [1], [0, 0, 1, 1], [], []>} : vector<32x32xbf16>, vector<32x64xbf16>, vector<32x64xf32> -> vector<32x64xf32>
    %c0_10 = arith.constant 0 : index
    %c0_11 = arith.constant 0 : index
    %c0_12 = arith.constant 0 : index
    %31 = vector.load %arg3[%c0_10, %c0_11, %c0_12] : memref<1x32x64xf32, #tpu.memory_space<vmem>>, vector<1x32x64xf32>
    %32 = vector.shape_cast %31 : vector<1x32x64xf32> to vector<32x64xf32>
    %33 = vector.shape_cast %30 : vector<32x64xf32> to vector<1x32x64xf32>
    tpu.vector_store %arg3[%c0_10, %c0_11, %c0_12], %33 {strides = array<i32>} : memref<1x32x64xf32, #tpu.memory_space<vmem>>, vector<1x32x64xf32>,
    return
  }
  func.func @transform_0(%arg0: i32) -> (i32, i32, i32) {
    %c0_i32 = arith.constant 0 : i32
    %c0_i32_0 = arith.constant 0 : i32
    %c0_i32_1 = arith.constant 0 : i32
    return %arg0, %c0_i32, %c0_i32_0 : i32, i32, i32
  }
  func.func @transform_1(%arg0: i32) -> (i32, i32) {
    %c0_i32 = arith.constant 0 : i32
    %c0_i32_0 = arith.constant 0 : i32
    %c0_i32_1 = arith.constant 0 : i32
    return %c0_i32, %c0_i32_0 : i32, i32
  }
  func.func @transform_2(%arg0: i32) -> (i32, i32, i32) {
    %c0_i32 = arith.constant 0 : i32
    %c0_i32_0 = arith.constant 0 : i32
    %c0_i32_1 = arith.constant 0 : i32
    return %arg0, %c0_i32, %c0_i32_0 : i32, i32, i32
  }
}

</mosaic_0001>

<bundles_post_ra>
// kernel: head_forward.1
= control target key start
LH: loop header
LB: loop body
LE: loop exit
PB: predicated region body
PF: predicated region fallthrough
CT: control target
= control target key end

     0   :  { %7 = vsyncpa [#allocation3], 0  ;;  %s1416_s0 = inlined_call_operand.vmem [shape: f32[2,32,384], index: 0, kind: input, shape index: {}]   ;;  %s1417_s1 = inlined_call_operand.vmem [shape: bf16[384,192], index: 1, kind: input, shape index: {}]   ;;  %s1418_s2 = inlined_call_operand.hbm [shape: f32[2,32,64], index: 2, kind: output, shape index: {}]  }
   0x1   :  { %9 = vsyncpa [#allocation3 + $0x1], 0  ;;  %s1134_s9 = smov 0   ;;  %s1136_s10 = smov 0  }
   0x2   :  { %s1138_s11 = smov 0   ;;  %s1140_s12 = smov 0  }
   0x3 LB: > { %s1155_s13 = sadd.s32 4294967295, %s1112_s12   ;;  %s830_s14 = sadd.s32 4294967294, %s1112_s12   ;;  %s1112_s12 = sphi %s1140_s12, %s1424_s12   ;;  %s1108_s11 = sphi %s1138_s11, %s1423_s11   ;;  %s1104_s10 = sphi %s1136_s10, %s1422_s10   ;;  %s1100_s9 = sphi %s1134_s9, %s1421_s9  }
   0x4   : > { %s1159_s15 = sadd.s32 1, %s1112_s12   ;;  %s69_s16 = sadd.s32 1, %s1108_s11 }
   0x5   : > { %s66_s17 = ssub.s32 %s1112_s12, %s1159_s15  ;;  %p79_p0 = scmp.ne.s32.totalorder %s1108_s11, %s1104_s10 }
   0x6   : > { %p67_p1 = scmp.eq.s32.totalorder %s66_s17, 0  ;;  %p80_p2 = scmp.eq.s32.totalorder %s1155_s13, 1 }
   0x7   : > { %p85_p3 = scmp.ne.s32.totalorder %s1104_s10, %s1100_s9  ;;  %p86_p4 = scmp.eq.s32.totalorder %s830_s14, 1 }
   0x8   : > { %s1170_s18 = scalar_select %p67_p1, %s1108_s11, %s69_s16  }
   0x9   : > { %p1172_p5 = por %p80_p2, %p79_p0  ;;  %p1176_p6 = por %p86_p4, %p85_p3 }
   0xa   : > { %p833_p7 = scmp.ge.s32.totalorder %s1112_s12, 1  ;;  %p115_p8 = scmp.lt.s32.totalorder %s1112_s12, 3 }
   0xc   : > { %p116_p9 = pnand %p833_p7, %p115_p8 }
   0xd   : > { %p137_p10 = scmp.lt.s32.totalorder (!%p116_p9), %s1155_s13, 1  ;;  %s134_s28 = sand.u32 (!%p116_p9), 1, %s1104_s10  }
   0xe   : > { %119 = sbr.rel (%p116_p9) target bundleno = 1157 (0x485), region = 28  ;;  %s893_s5 = sshll.u32 (!%p116_p9), %s1155_s13, 9 }
   0xf   : > { %s1372_s8 = scalar_lea.hbm (!%p116_p9), %s1418_s2, %s893_s5 }
  0x13   : > { %v964_v0 = vld [vmem:[%s1417_s1 + $0x74] ss:$8 sps:$4 sm:$0xff]   ;;  %v966_v1 = vld [vmem:[%s1417_s1 + $0x70] ss:$8 sps:$4 sm:$0xff]   ;;  %v1114_v2 = vmov 0   ;;  %s138_s29 = scalar_select %p137_p10, %s1155_s13, 1 }
  0x14   : > { %534 = vmatprep.mubr.bf16.mxu1 %v1114_v2  ;;  %449 = vmatprep.subr.bf16.mxu0 %v964_v0  ;;  %v967_v3 = vld [vmem:[%s1417_s1 + $0x64] ss:$8 sps:$4 sm:$0xff]   ;;  %v969_v4 = vld [vmem:[%s1417_s1 + $0x60] ss:$8 sps:$4 sm:$0xff]   ;;  %v970_v5 = vld [vmem:[%s1417_s1 + $0x54] ss:$8 sps:$4 sm:$0xff]  }
  0x15   : > { %450 = vmatpush1.bf16.msra.mxu0 %v966_v1  ;;  %v972_v6 = vld [vmem:[%s1417_s1 + $0x50] ss:$8 sps:$4 sm:$0xff]   ;;  %v973_v7 = vld [vmem:[%s1417_s1 + $0x44] ss:$8 sps:$4 sm:$0xff]   ;;  %v985_v8 = vld [vmem:[%s1417_s1 + $0x174] ss:$8 sps:$4 sm:$0xff]  }
  0x16   : > { %451 = vmatprep.subr.bf16.mxu0 %v967_v3  ;;  %v987_v9 = vld [vmem:[%s1417_s1 + $0x170] ss:$8 sps:$4 sm:$0xff]   ;;  %v975_v10 = vld [vmem:[%s1417_s1 + $0x40] ss:$8 sps:$4 sm:$0xff]   ;;  %v976_v11 = vld [vmem:[%s1417_s1 + $0x34] ss:$8 sps:$4 sm:$0xff]   ;;  %502 = vmatprep.subr.bf16.mxu1 %v985_v8 }
  0x17   : > { %v991_v12 = vld [vmem:[%s1417_s1 + $0x164] ss:$8 sps:$4 sm:$0xff]   ;;  %503 = vmatpush1.bf16.msra.mxu1 %v987_v9  ;;  %v993_v13 = vld [vmem:[%s1417_s1 + $0x160] ss:$8 sps:$4 sm:$0xff]   ;;  %v978_v14 = vld [vmem:[%s1417_s1 + $0x30] ss:$8 sps:$4 sm:$0xff]  }
  0x18   : > { %504 = vmatprep.subr.bf16.mxu1 %v991_v12  ;;  %v997_v15 = vld [vmem:[%s1417_s1 + $0x154] ss:$8 sps:$4 sm:$0xff]   ;;  %v979_v16 = vld [vmem:[%s1417_s1 + $0x24] ss:$8 sps:$4 sm:$0xff]   ;;  %v999_v17 = vld [vmem:[%s1417_s1 + $0x150] ss:$8 sps:$4 sm:$0xff]  }
  0x19   : > { %452 = vmatpush1.bf16.msra.mxu0 %v969_v4  ;;  %v1003_v18 = vld [vmem:[%s1417_s1 + $0x144] ss:$8 sps:$4 sm:$0xff]   ;;  %v981_v19 = vld [vmem:[%s1417_s1 + $0x20] ss:$8 sps:$4 sm:$0xff]   ;;  %v982_v20 = vld [vmem:[%s1417_s1 + $0x14] ss:$8 sps:$4 sm:$0xff]  }
  0x1a   : > { %453 = vmatprep.subr.bf16.mxu0 %v970_v5  ;;  %v1005_v21 = vld [vmem:[%s1417_s1 + $0x140] ss:$8 sps:$4 sm:$0xff]   ;;  %v1009_v22 = vld [vmem:[%s1417_s1 + $0x134] ss:$8 sps:$4 sm:$0xff]   ;;  %v984_v23 = vld [vmem:[%s1417_s1 + $0x10] ss:$8 sps:$4 sm:$0xff]  }
  0x1b   : > { %505 = vmatpush1.bf16.msra.mxu1 %v993_v13  ;;  %v988_v24 = vld [vmem:[%s1417_s1 + $0x4] ss:$8 sps:$4 sm:$0xff]   ;;  %v1011_v25 = vld [vmem:[%s1417_s1 + $0x130] ss:$8 sps:$4 sm:$0xff]   ;;  %v990_v27 = vld [vmem:[%s1417_s1] ss:$8 sps:$4 sm:$0xff]  }
  0x1c   : > { %506 = vmatprep.subr.bf16.mxu1 %v997_v15  ;;  %v1015_v26 = vld [vmem:[%s1417_s1 + $0x124] ss:$8 sps:$4 sm:$0xff]   ;;  %s920_s16 = smul.u32 96, %s138_s29  ;;  %v994_v28 = vld [vmem:[%s1417_s1 + $0xf4] ss:$8 sps:$4 sm:$0xff]   ;;  %vm569_vm0 = vcmask 523264  }
  0x1d   : > { %454 = vmatpush1.bf16.msra.mxu0 %v972_v6  ;;  %v1017_v29 = vld [vmem:[%s1417_s1 + $0x120] ss:$8 sps:$4 sm:$0xff]   ;;  %v1021_v30 = vld [vmem:[%s1417_s1 + $0x114] ss:$8 sps:$4 sm:$0xff]   ;;  %v996_v31 = vld [vmem:[%s1417_s1 + $0xf0] ss:$8 sps:$4 sm:$0xff]  }
  0x1e   : > { %455 = vmatprep.subr.bf16.mxu0 %v973_v7  ;;  %s1281_s30 = scalar_lea.vmem %s1416_s0, %s920_s16  ;;  %v1000_v32 = vld [vmem:[%s1417_s1 + $0xe4] ss:$8 sps:$4 sm:$0xff]   ;;  %v1023_v34 = vld [vmem:[%s1417_s1 + $0x110] ss:$8 sps:$4 sm:$0xff]   ;;  %v1002_v38 = vld [vmem:[%s1417_s1 + $0xe0] ss:$8 sps:$4 sm:$0xff]  }
  0x1f   : > { %507 = vmatpush1.bf16.msra.mxu1 %v999_v17  ;;  %v144_v33 = vld [vmem:[%s1281_s30 + $0x8] sm:$0xff]  ;;  %v147_v35 = vld [vmem:[%s1281_s30 + $0x20] sm:$0xff]  ;;  %v1006_v39 = vld [vmem:[%s1417_s1 + $0xd4] ss:$8 sps:$4 sm:$0xff]   ;;  %vm646_vm2 = vcmask 261120   ;;  %s834_s29 = sshll.u32 %s134_s28, 5 }
  0x20   : > { %508 = vmatprep.subr.bf16.mxu1 %v1003_v18  ;;  %v1027_v36 = vld [vmem:[%s1417_s1 + $0x104] ss:$8 sps:$4 sm:$0xff]   ;;  %v156_v37 = vpack.c.bf16 %v147_v35, %v144_v33  ;;  %v1029_v40 = vld [vmem:[%s1417_s1 + $0x100] ss:$8 sps:$4 sm:$0xff]   ;;  %v145_v41 = vld [vmem:[%s1281_s30 + $0x10] sm:$0xff]  ;;  %s136_s3 = scalar_lea.vmem [#allocation2], %s834_s29 }
  0x21   : > { %456 = vmatpush1.bf16.msra.mxu0 %v975_v10  ;;  %v148_v42 = vld [vmem:[%s1281_s30 + $0x28] sm:$0xff]  ;;  %v1008_v43 = vld [vmem:[%s1417_s1 + $0xd0] ss:$8 sps:$4 sm:$0xff]   ;;  %v1018_v47 = vld [vmem:[%s1417_s1 + $0xb4] ss:$8 sps:$4 sm:$0xff]   ;;  %s768_s4 = sshll.u32 %s136_s3, 4  ;;  %s1367_s4 = int_to_ptr.vmem [resolvable:$true] %s768_s4 }
  0x22   : > { %457 = vmatprep.subr.bf16.mxu0 %v976_v11  ;;  %481 = vmatprep.mubr.bf16.mxu0 %v156_v37  ;;  %v1012_v44 = vld [vmem:[%s1417_s1 + $0xc4] ss:$8 sps:$4 sm:$0xff]   ;;  %v157_v45 = vpack.c.bf16 %v148_v42, %v145_v41  ;;  %v1014_v46 = vld [vmem:[%s1417_s1 + $0xc0] ss:$8 sps:$4 sm:$0xff]   ;;  %v154_v49 = vld [vmem:[%s1281_s30 + $0x58] sm:$0xff]  ;;  %v631_v41 = vlaneseq  ;;  %s1376_s13 = scalar_lea.sflag [#allocation3], %s134_s28 }
  0x23   : > { %509 = vmatpush1.bf16.msra.mxu1 %v1005_v21  ;;  %v151_v48 = vld [vmem:[%s1281_s30 + $0x40] sm:$0xff]  ;;  %v1020_v50 = vld [vmem:[%s1417_s1 + $0xb0] ss:$8 sps:$4 sm:$0xff]   ;;  %v1030_v54 = vld [vmem:[%s1417_s1 + $0x94] ss:$8 sps:$4 sm:$0xff]   ;;  %s1052_s14 = scalar_lea.vmem %s1367_s4, 512 }
  0x24   : > { %510 = vmatprep.subr.bf16.mxu1 %v1009_v22  ;;  %v1024_v51 = vld [vmem:[%s1417_s1 + $0xa4] ss:$8 sps:$4 sm:$0xff]   ;;  %v160_v52 = vpack.c.bf16 %v154_v49, %v151_v48  ;;  %v1026_v53 = vld [vmem:[%s1417_s1 + $0xa0] ss:$8 sps:$4 sm:$0xff]   ;;  %v1032_v55 = vld [vmem:[%s1417_s1 + $0x90] ss:$8 sps:$4 sm:$0xff]   ;;  %p1053_p11 = scmp.ne.s32.totalorder %s1367_s4, %s1052_s14 }
  0x25   : > { %458 = vmatpush1.bf16.msra.mxu0 %v978_v14  ;;  %v1033_v56 = vld [vmem:[%s1417_s1 + $0x84] ss:$8 sps:$4 sm:$0xff]   ;;  %v1035_v57 = vld [vmem:[%s1417_s1 + $0x80] ss:$8 sps:$4 sm:$0xff]   ;;  %v146_v59 = vld [vmem:[%s1281_s30 + $0x18] sm:$0xff]  ;;  %v632_v42 = vshrl.u32 %v631_v41, 7 }
  0x26   : > { %459 = vmatprep.subr.bf16.mxu0 %v979_v16  ;;  %v143_v58 = vld [vmem:[%s1281_s30] sm:$0xff]  ;;  %v150_v60 = vld [vmem:[%s1281_s30 + $0x38] sm:$0xff]  ;;  %v153_v61 = vld [vmem:[%s1281_s30 + $0x50] sm:$0xff]  ;;  %p1054_p12 = pnand %p1053_p11, %p1172_p5  ;;  %s1116_s16 = smov [#allocation2]  }
  0x27   : > { %511 = vmatpush1.bf16.msra.mxu1 %v1011_v25  ;;  %v155_v62 = vpack.c.bf16 %v146_v59, %v143_v58  ;;  %v159_v63 = vpack.c.bf16 %v153_v61, %v150_v60  ;;  %v149_v0 = vld [vmem:[%s1281_s30 + $0x30] sm:$0xff]  ;;  %v152_v1 = vld [vmem:[%s1281_s30 + $0x48] sm:$0xff]  ;;  %s1115_s30 = smov 64   ;;  %s1056_s17 = sshll.u32 %s1116_s16, 4  ;;  %s1057_s17 = int_to_ptr.vmem [resolvable:$false] %s1056_s17 }
  0x28   : > { %512 = vmatprep.subr.bf16.mxu1 %v1015_v26  ;;  %p1055_p13 = pneg %p1054_p12  ;;  %s1058_s21 = scalar_lea.vmem %s1057_s17, 1024 }
  0x29   : > { %460 = vmatpush1.bf16.msra.mxu0 %v981_v19  ;;  %p1059_p0 = scmp.lt.s32.totalorder %s1367_s4, %s1057_s17  ;;  %p1060_p1 = scmp.lt.s32.totalorder %s1058_s21, %s1052_s14 }
  0x2a   : > { %461 = vmatprep.subr.bf16.mxu0 %v982_v20 }
  0x2b   : > { %513 = vmatpush1.bf16.msra.mxu1 %v1017_v29  ;;  %p1061_p2 = por %p1060_p1, %p1059_p0 }
  0x2c   : > { %514 = vmatprep.subr.bf16.mxu1 %v1021_v30 }
  0x2d   : > { %462 = vmatpush1.bf16.msra.mxu0 %v984_v23  ;;  %p1062_p3 = pnand %p1061_p2, %p1055_p13 }
  0x2e   : > { %463 = vmatprep.subr.bf16.mxu0 %v988_v24 }
  0x2f   : > { %515 = vmatpush1.bf16.msra.mxu1 %v1023_v34 }
  0x30   : > { %516 = vmatprep.subr.bf16.mxu1 %v1027_v36 }
  0x31   : > { %464 = vmatpush1.bf16.msra.mxu0 %v990_v27 }
  0x32   : > { %465 = vmatprep.subr.bf16.mxu0 %v994_v28 }
  0x33   : > { %517 = vmatpush1.bf16.msra.mxu1 %v1029_v40 }
  0x35   : > { %466 = vmatpush2.bf16.msra.mxu0 %v996_v31 }
  0x36   : > { %467 = vmatprep.subr.bf16.mxu0 %v1000_v32  ;;  %535 = vmatmul.mubr.bf16.vlgmr.msra.gmra.mxu1 %v157_v45 }
  0x37   : > { %544 = vmatprep.mubr.bf16.mxu1 %v1114_v2  ;;  %v158_v2 = vpack.c.bf16 %v152_v1, %v149_v0 }
  0x39   : > { %468 = vmatpush2.bf16.msra.mxu0 %v1002_v38 }
  0x3a   : > { %469 = vmatprep.subr.bf16.mxu0 %v1006_v39 }
  0x3d   : > { %470 = vmatpush2.bf16.msra.mxu0 %v1008_v43  ;;  %v634_v43 = vadd.s32 16, %v632_v42 }
  0x3e   : > { %471 = vmatprep.subr.bf16.mxu0 %v1012_v44  ;;  %545 = vmatmul.mubr.bf16.gmra.mxu1 %v160_v52  ;;  %v637_v44 = vand.u32 127, %v631_v41 }
  0x40   : > { %vm640_vm1 = vcmp.le.s32.totalorder %v637_v44, %v634_v43  ;;  %vm638_vm3 = vcmp.le.s32.totalorder %v637_v44, %v632_v42 }
  0x41   : > { %472 = vmatpush2.bf16.msra.mxu0 %v1014_v46  ;;  %v633_v46 = vadd.s32 8, %v632_v42 }
  0x42   : > { %473 = vmatprep.subr.bf16.mxu0 %v1018_v47 }
  0x43   : > { %vm639_vm4 = vcmp.le.s32.totalorder %v637_v44, %v633_v46 }
  0x45   : > { %474 = vmatpush2.bf16.msra.mxu0 %v1020_v50  ;;  %v635_v50 = vadd.s32 24, %v632_v42 }
  0x46   : > { %475 = vmatprep.subr.bf16.mxu0 %v1024_v51 }
  0x47   : > { %vm641_vm5 = vcmp.le.s32.totalorder %v637_v44, %v635_v50 }
  0x49   : > { %476 = vmatpush2.bf16.msra.mxu0 %v1026_v53 }
  0x4a   : > { %477 = vmatprep.subr.bf16.mxu0 %v1030_v54 }
  0x4d   : > { %478 = vmatpush2.bf16.msra.mxu0 %v1032_v55 }
  0x4e   : > { %479 = vmatprep.subr.bf16.mxu0 %v1033_v56 }
  0x51   : > { %480 = vmatpush2.bf16.msra.mxu0 %v1035_v57 }
  0x54   : > { %482 = vmatmul.mubr.bf16.vlgmr.msra.gmra.mxu0 %v155_v62 }
  0x55   : > { %491 = vmatprep.mubr.bf16.mxu0 %v159_v63 }
  0x5c   : > { %492 = vmatmul.mubr.bf16.gmra.mxu0 %v158_v2 }
  0xf6   : > { %v536_v3 = vpop.f32.mrf.mxu1 }
  0xf8   : > { %v538_v4 = vpop.f32.mrf.mxu1 }
  0xfa   : > { %v540_v5 = vpop.f32.mrf.mxu1 }
  0xfc   : > { %v542_v7 = vpop.f32.mrf.mxu1 }
  0xfe   : > { %v546_v11 = vpop.f32.mrf.mxu1 }
 0x100   : > { %v548_v18 = vpop.f32.mrf.mxu1 }
 0x102   : > { %v550_v25 = vpop.f32.mrf.mxu1 }
 0x104   : > { %v552_v36 = vpop.f32.mrf.mxu1 }
 0x114   : > { %v483_v6 = vpop.f32.mrf.mxu0 }
 0x115   : > { %v537_v9 = vadd.f32 %v536_v3, %v483_v6 }
 0x116   : > { %v485_v8 = vpop.f32.mrf.mxu0 }
 0x117   : > { %v539_v10 = vadd.f32 %v538_v4, %v485_v8  ;;  %v555_v15 = vmul.f32 0.05103104, %v537_v9 }
 0x118   : > { %v487_v12 = vpop.f32.mrf.mxu0 }
 0x119   : > { %v541_v13 = vadd.f32 %v540_v5, %v487_v12 }
 0x11a   : > { %v489_v14 = vpop.f32.mrf.mxu0 }
 0x11b   : > { %v556_v16 = vmul.f32 0.05103104, %v541_v13  ;;  %v543_v17 = vadd.f32 %v542_v7, %v489_v14  ;;  %v561_v32 = vpack.c.bf16 %v541_v13, %v537_v9 }
 0x11c   : > { %v493_v19 = vpop.f32.mrf.mxu0 }
 0x11d   : > { %v559_v20 = vpack.c.bf16 %v556_v16, %v555_v15  ;;  %v693_v21 = vpack.c.bf16 %v543_v17, %v539_v10  ;;  %v547_v23 = vadd.f32 %v546_v11, %v493_v19 }
 0x11e   : > { %v495_v22 = vpop.f32.mrf.mxu0 }
 0x11f   : > { %v549_v24 = vadd.f32 %v548_v18, %v495_v22  ;;  %906 = vmatprep.mubr.msk.bf16.mxu1 %vm569_vm0, %v559_v20  ;;  %v557_v28 = vmul.f32 0.05103104, %v547_v23 }
 0x120   : > { %v497_v26 = vpop.f32.mrf.mxu0 }
 0x121   : > { %v551_v27 = vadd.f32 %v550_v25, %v497_v26 }
 0x122   : > { %v499_v35 = vpop.f32.mrf.mxu0 }
 0x123   : > { %v558_v29 = vmul.f32 0.05103104, %v551_v27  ;;  %v562_v30 = vpack.c.bf16 %v551_v27, %v547_v23  ;;  %v553_v38 = vadd.f32 %v552_v36, %v499_v35 }
 0x125   : > { %v560_v31 = vpack.c.bf16 %v558_v29, %v557_v28  ;;  %567 = vrot.lane.b32.xlu0 %v562_v30, %s1115_s30  ;;  %v694_v39 = vpack.c.bf16 %v553_v38, %v549_v24 }
 0x129   : > { %565 = vrot.lane.b32.xlu0 %v561_v32, %s1115_s30 }
 0x197   : > { %v568_v33 = vpop.permute.xlu0 %567 }
 0x198   : > { %v580_v34 = vsel %vm569_vm0, %v568_v33, 0  ;;  %918 = vmatprep.subr.msk.bf16.mxu1 %vm569_vm0, %v568_v33 }
 0x199   : > { %903 = vmatpush3.bf16.xpose.msra.mxu1 %v580_v34 }
 0x19b   : > { %v566_v37 = vpop.permute.xlu0 %565 }
 0x19c   : > { %919 = vmatprep.subr.msk.bf16.mxu1 %vm569_vm0, %v566_v37  ;;  %v577_v40 = vsel %vm569_vm0, %v566_v37, 0 }
 0x1a1   : > { %905 = vmatpush3.bf16.xpose.msra.mxu1 %v577_v40 }
 0x1a2   : > { %910 = vmatprep.subr.bf16.mxu1 %v694_v39 }
 0x1a8   : > { %907 = vmatmul.mubr.msk.bf16.vlgmr.msra.gmra.mxu1 %vm569_vm0, %v560_v31 }
 0x1a9   : > { %911 = vmatpush3.bf16.msra.mxu1 %v694_v39 }
 0x1aa   : > { %912 = vmatprep.subr.bf16.mxu1 %v693_v21 }
 0x1ad   : > { %913 = vmatpush3.bf16.msra.mxu1 %v693_v21 }
 0x268   : > { %v908_v45 = vpop.f32.mrf.mxu1 }
 0x269   : > { %v644_v47 = vsel %vm640_vm1, %v908_v45, -1e+30 }
 0x26a   : > { %v616_v48 = vpop.f32.mrf.mxu1  ;;  %v653_v49 = vsel %vm646_vm2, %v644_v47, -inf }
 0x26b   : > { %v642_v51 = vsel %vm638_vm3, %v616_v48, -1e+30  ;;  %654 = vmax.xlane.f32.xlu0 %v653_v49 }
 0x26c   : > { %v909_v52 = vpop.f32.mrf.mxu1  ;;  %v647_v53 = vsel %vm646_vm2, %v642_v51, -inf }
 0x26d   : > { %648 = vmax.xlane.f32.xlu1 %v647_v53  ;;  %v645_v57 = vsel %vm641_vm5, %v909_v52, -1e+30 }
 0x26e   : > { %v619_v54 = vpop.f32.mrf.mxu1  ;;  %v656_v58 = vsel %vm646_vm2, %v645_v57, -inf }
 0x26f   : > { %v643_v55 = vsel %vm639_vm4, %v619_v54, -1e+30 }
 0x270   : > { %v650_v56 = vsel %vm646_vm2, %v643_v55, -inf }
 0x271   : > { %651 = vmax.xlane.f32.xlu1 %v650_v56 }
 0x275   : > { %657 = vmax.xlane.f32.xlu1 %v656_v58 }
 0x2f4   : > { %v655_v59 = vpop.xlane.xlu0 %654 }
 0x2f5   : > { %v661_v60 = vsub.f32 %v644_v47, %v655_v59 }
 0x2f6   : > { %v649_v61 = vpop.xlane.xlu1 %648 }
 0x2f7   : > { %v667_v62 = vmul.f32 1.442695, %v661_v60  ;;  %v659_v63 = vsub.f32 %v642_v51, %v649_v61 }
 0x2f9   : > { %1036 = vpow2.f32 %v667_v62  ;;  %v663_v0 = vmul.f32 1.442695, %v659_v63 }
 0x2fa   : > { %v652_v1 = vpop.xlane.xlu1 %651 }
 0x2fb   : > { %1038 = vpow2.f32 %v663_v0  ;;  %v660_v2 = vsub.f32 %v643_v55, %v652_v1 }
 0x2fd   : > { %v665_v3 = vmul.f32 1.442695, %v660_v2 }
 0x2fe   : > { %v658_v4 = vpop.xlane.xlu1 %657 }
 0x2ff   : > { %1040 = vpow2.f32 %v665_v3  ;;  %v662_v5 = vsub.f32 %v645_v57, %v658_v4 }
 0x301   : > { %v669_v6 = vmul.f32 1.442695, %v662_v5 }
 0x303   : > { %1042 = vpow2.f32 %v669_v6 }
 0x306   : > { %v1037_v7 = vpop.eup %1036 }
 0x307   : > { %v677_v8 = vsel %vm646_vm2, %v1037_v7, 0.0 }
 0x308   : > { %v1039_v9 = vpop.eup %1038  ;;  %678 = vadd.xlane.f32.xlu1 %v677_v8 }
 0x309   : > { %v671_v10 = vsel %vm646_vm2, %v1039_v9, 0.0 }
 0x30c   : > { %v1041_v11 = vpop.eup %1040  ;;  %672 = vadd.xlane.f32.xlu1 %v671_v10 }
 0x30d   : > { %v674_v12 = vsel %vm646_vm2, %v1041_v11, 0.0 }
 0x310   : > { %v1043_v13 = vpop.eup %1042  ;;  %675 = vadd.xlane.f32.xlu1 %v674_v12 }
 0x311   : > { %v680_v14 = vsel %vm646_vm2, %v1043_v13, 0.0 }
 0x314   : > { %681 = vadd.xlane.f32.xlu1 %v680_v14 }
 0x391   : > { %v679_v15 = vpop.xlane.xlu1 %678 }
 0x395   : > { %v673_v16 = vpop.xlane.xlu1 %672 }
 0x396   : > { %1044 = vrcp.f32 %v673_v16 }
 0x399   : > { %v676_v17 = vpop.xlane.xlu1 %675 }
 0x39a   : > { %1046 = vrcp.f32 %v676_v17 }
 0x39b   : > { %1048 = vrcp.f32 %v679_v15 }
 0x39d   : > { %v682_v18 = vpop.xlane.xlu1 %681 }
 0x39e   : > { %1050 = vrcp.f32 %v682_v18 }
 0x3a3   : > { %v1045_v19 = vpop.eup %1044 }
 0x3a4   : > { %v687_v21 = vmul.f32 %v1045_v19, %v1039_v9 }
 0x3a7   : > { %v1047_v20 = vpop.eup %1046 }
 0x3a8   : > { %v688_v22 = vmul.f32 %v1047_v20, %v1041_v11  ;;  %v1049_v23 = vpop.eup %1048 }
 0x3a9   : > { %v689_v27 = vmul.f32 %v1049_v23, %v1037_v7 }
 0x3aa   : > { %v691_v24 = vpack.c.bf16 %v688_v22, %v687_v21 }
 0x3ab   : > { %v1051_v25 = vpop.eup %1050 }
 0x3ac   : > { %v690_v26 = vmul.f32 %v1051_v25, %v1043_v13  ;;  %914 = vmatprep.mubr.msk.bf16.mxu1 %vm646_vm2, %v691_v24 }
 0x3ae   : > { %v692_v28 = vpack.c.bf16 %v690_v26, %v689_v27 }
 0x3b0   : > { %915 = vmatmul.mubr.msk.bf16.vlgmr.msra.gmra.mxu1 %vm646_vm2, %v692_v28 }
 0x470   : > { %v916_v29 = vpop.f32.mrf.mxu1 }
 0x471   : > { %752 = vst.msk [vmem:[%s136_s3 + $0x10] sm:$0xff] %vm569_vm0, %v916_v29 }
 0x472   : > { %v735_v30 = vpop.f32.mrf.mxu1 }
 0x473   : > { %750 = vst.msk [vmem:[%s136_s3] sm:$0xff] %vm569_vm0, %v735_v30 }
 0x474   : > { %v917_v31 = vpop.f32.mrf.mxu1 }
 0x475   : > { %753 = vst.msk [vmem:[%s136_s3 + $0x18] sm:$0xff] %vm569_vm0, %v917_v31 }
 0x476   : > { %v738_v32 = vpop.f32.mrf.mxu1 }
 0x477   : > { %751 = vst.msk [vmem:[%s136_s3 + $0x8] sm:$0xff] %vm569_vm0, %v738_v32 }
 0x478   : > { %1065 = shalt.err (!%p1062_p3)
}
 0x479   : > { %s1066_s22 = scalar_lea.hbm %s1372_s8, 512  ;;  %s1070_s25 = scalar_lea.hbm %s1418_s2, 1024 }
 0x47a   : > { %p1067_p4 = scmp.ne.s32.totalorder %s1372_s8, %s1066_s22  ;;  %p1071_p9 = scmp.lt.s32.totalorder %s1372_s8, %s1418_s2 }
 0x47b   : > { %p1072_p10 = scmp.lt.s32.totalorder %s1070_s25, %s1066_s22 }
 0x47c   : > { %p1068_p7 = pnand %p1067_p4, %p1172_p5 }
 0x47d   : > { %p1073_p11 = por %p1072_p10, %p1071_p9 }
 0x47e   : > { %p1069_p8 = pneg %p1068_p7 }
 0x480   : > { %p1074_p12 = pnand %p1073_p11, %p1069_p8 }
 0x482   : > { %1077 = shalt.err (!%p1074_p12)
}
 0x483   : > { %s1117_s30 = smov 128   ;;  %s1118_s28 = smov 8  }
 0x484   : > { %921 = dma.vmem_to_hbm [thread:$0]  (%p1172_p5), %s1367_s4, 512, %s1372_s8, %s1376_s13, %s1117_s30, %s1117_s30, %s1118_s28  }
 0x485 PF: > { %p927_p13 = scmp.ge.s32.totalorder %s1112_s12, 2  ;;  %s783_s29 = sand.u32 1, %s1100_s9  }
 0x486   : > { %s784_s3 = scalar_lea.sflag [#allocation3], %s783_s29 }
 0x487   : > { %p924_p0 = pnand %p927_p13, %p1176_p6 }
 0x489   : > { %p925_p1 = pneg %p924_p0 }
 0x48b   : > { %1095 = dma.done.wait (%p925_p1), %s784_s3, 512  }
 0x48c   : > { %1097 = vsyncadd (%p925_p1), %s784_s3, 4294966784  ;;  %p12_p2 = scmp.ge.s32.totalorder %s1159_s15, 4   ;;  %s1421_s9 = smov %s1104_s10 }
 0x48d   : > { %s1422_s10 = smov %s1108_s11  ;;  %s1423_s11 = smov %s1170_s18 }
 0x48e   : > { %s1424_s12 = smov %s1159_s15  ;;  %14 = sbr.rel (!%p12_p2) target bundleno = 3 (0x3), region = 63 }
 0x493   :  { %789 = vsyncpa [#allocation3], 1 }
 0x494   :  { %791 = vsyncpa [#allocation3 + $0x1], 1 }

</bundles_post_ra>
